<compile_context>
chip_gen: v7x
topology: tpu7x:2x2x1
jax: 0.10.0
libtpu: 0.0.40
codegen_flags: <defaults>
</compile_context>

<pallas_src>
import jax
import jax.numpy as jnp
from jax.experimental import pallas as pl
from jax.experimental.pallas import tpu as pltpu

# channel split point from the PyTorch module: x[:, 24:]
THICKNESS_START = 24

LANE = 128
SUBLANE = 8
DEFAULT_BLOCK_ROWS = 512  # 512 * 128 * 4 B = 256 KiB per input per block


def _round_up(a: int, m: int) -> int:
    return ((a + m - 1) // m) * m


def _to_lane_dense(arr, block_rows=None):
    """Flatten `arr`, zero-pad, and reshape to (rows, 128) with rows a
    multiple of `block_rows` (and of the 8-sublane tile)."""
    flat = arr.reshape(-1)
    n = int(flat.shape[0])
    rows = max(_round_up(-(-n // LANE), SUBLANE), SUBLANE)
    if block_rows is None:
        block_rows = min(DEFAULT_BLOCK_ROWS, rows)
    rows = _round_up(rows, block_rows)
    padded = rows * LANE
    if padded != n:
        flat = jnp.pad(flat, (0, padded - n))
    return flat.reshape(rows, LANE), rows, block_rows


def _ssd_partial_kernel(a_ref, b_ref, out_ref):
    # Per-block, per-lane partial sum of squared differences.
    d = a_ref[...].astype(jnp.float32) - b_ref[...].astype(jnp.float32)
    out_ref[0] = jnp.sum(d * d, axis=0, keepdims=True)   # (1, 128)


def _ss_partial_kernel(a_ref, out_ref):
    # Per-block, per-lane partial sum of squares (target is zeros).
    a = a_ref[...].astype(jnp.float32)
    out_ref[0] = jnp.sum(a * a, axis=0, keepdims=True)    # (1, 128)


def _blocked_sum_sq_diff(a2d, b2d, rows, block_rows):
    num_blocks = rows // block_rows
    partials = pl.pallas_call(
        _ssd_partial_kernel,
        out_shape=jax.ShapeDtypeStruct((num_blocks, 1, LANE), jnp.float32),
        grid=(num_blocks,),
        in_specs=[
            pl.BlockSpec((block_rows, LANE), lambda i: (i, 0)),
            pl.BlockSpec((block_rows, LANE), lambda i: (i, 0)),
        ],
        out_specs=pl.BlockSpec((1, 1, LANE), lambda i: (i, 0, 0)),
        compiler_params=pltpu.CompilerParams(dimension_semantics=("parallel",)),
    )(a2d, b2d)
    return jnp.sum(partials)


def _blocked_sum_sq(a2d, rows, block_rows):
    num_blocks = rows // block_rows
    partials = pl.pallas_call(
        _ss_partial_kernel,
        out_shape=jax.ShapeDtypeStruct((num_blocks, 1, LANE), jnp.float32),
        grid=(num_blocks,),
        in_specs=[pl.BlockSpec((block_rows, LANE), lambda i: (i, 0))],
        out_specs=pl.BlockSpec((1, 1, LANE), lambda i: (i, 0, 0)),
        compiler_params=pltpu.CompilerParams(dimension_semantics=("parallel",)),
    )(a2d)
    return jnp.sum(partials)


def my_loss_pallas(noise1, noise2, x):
    assert noise1.shape == noise2.shape, "noise1/noise2 must have the same shape"
    assert x.ndim >= 2 and x.shape[1] > THICKNESS_START, "x needs >24 channels"

    # Pre-slice the channel tail in the wrapper: only useful bytes get DMA'd.
    x_tail = x[:, THICKNESS_START:]

    n_noise = noise1.size            # true element counts (pre-padding)
    n_thick = x_tail.size

    # Lane-dense 2D layouts (zero padding contributes 0 to both sums).
    a2d, rows_n, blk_n = _to_lane_dense(noise1)
    b2d, _, _ = _to_lane_dense(noise2, block_rows=blk_n)
    t2d, rows_t, blk_t = _to_lane_dense(x_tail)

    sse_noise = _blocked_sum_sq_diff(a2d, b2d, rows_n, blk_n)
    sse_thick = _blocked_sum_sq(t2d, rows_t, blk_t)

    # Final tiny weighted combine in the wrapper (keeps the kernel output
    # lane-dense and the grid fully parallel).
    return (sse_noise / float(n_noise)
            + 0.4 * (sse_thick / float(n_thick))).astype(jnp.float32)


def my_loss_ref(noise1, noise2, x):
    """Plain-JAX reference matching the PyTorch module exactly."""
    loss = jnp.mean((noise1.astype(jnp.float32) - noise2.astype(jnp.float32)) ** 2)
    tail = x[:, THICKNESS_START:].astype(jnp.float32)
    return loss + 0.4 * jnp.mean(tail * tail)


if __name__ == "__main__":
    key = jax.random.PRNGKey(0)
    k1, k2, k3 = jax.random.split(key, 3)

    # Small DDPM-like shapes (NCHW). x must have >24 channels for x[:, 24:].
    noise1 = jax.random.normal(k1, (2, 32, 16, 16), dtype=jnp.float32)
    noise2 = jax.random.normal(k2, (2, 32, 16, 16), dtype=jnp.float32)
    x = jax.random.normal(k3, (2, 32, 16, 16), dtype=jnp.float32)

    loss_fn = jax.jit(my_loss_pallas)
    out = jax.block_until_ready(loss_fn(noise1, noise2, x))
    ref = jax.block_until_ready(my_loss_ref(noise1, noise2, x))

    assert jnp.allclose(out, ref, rtol=1e-5, atol=1e-5), (out, ref)
    print("KERNEL_OK")
</pallas_src>

<mosaic_0001>
module attributes {stable_mosaic.version = 11 : i64} {
  func.func @_ssd_partial_kernel(%arg0: i32, %arg1: memref<128x128xf32, #tpu.memory_space<vmem>>, %arg2: memref<128x128xf32, #tpu.memory_space<vmem>>, %arg3: memref<1x1x128xf32, #tpu.memory_space<vmem>>) attributes {dimension_semantics = [#tpu.dimension_semantics<parallel>], iteration_bounds = array<i64: 1>, scalar_prefetch = 0 : i64, scratch_operands = 0 : i64, tpu.core_type = #tpu.core_type<tc>, window_params = [{transform_indices = @transform_0, window_bounds = array<i64: 128, 128>}, {transform_indices = @transform_1, window_bounds = array<i64: 128, 128>}, {transform_indices = @transform_2, window_bounds = array<i64: 1, 1, 128>}]} {
    %c0 = arith.constant 0 : index
    %c0_0 = arith.constant 0 : index
    %0 = vector.load %arg1[%c0, %c0_0] : memref<128x128xf32, #tpu.memory_space<vmem>>, vector<128x128xf32>
    %c0_1 = arith.constant 0 : index
    %c0_2 = arith.constant 0 : index
    %1 = vector.load %arg2[%c0_1, %c0_2] : memref<128x128xf32, #tpu.memory_space<vmem>>, vector<128x128xf32>
    %2 = arith.subf %0, %1 : vector<128x128xf32>
    %3 = arith.mulf %2, %2 : vector<128x128xf32>
    %cst = arith.constant dense<0.000000e+00> : vector<128xf32>
    %4 = vector.multi_reduction <add>, %3, %cst [0] : vector<128x128xf32> to vector<128xf32>
    %5 = vector.shape_cast %4 : vector<128xf32> to vector<1x128xf32>
    %c0_3 = arith.constant 0 : index
    %c0_4 = arith.constant 0 : index
    %c0_5 = arith.constant 0 : index
    %6 = vector.load %arg3[%c0_3, %c0_4, %c0_5] : memref<1x1x128xf32, #tpu.memory_space<vmem>>, vector<1x1x128xf32>
    %7 = vector.shape_cast %6 : vector<1x1x128xf32> to vector<1x128xf32>
    %8 = vector.shape_cast %5 : vector<1x128xf32> to vector<1x1x128xf32>
    tpu.vector_store %arg3[%c0_3, %c0_4, %c0_5], %8 {strides = array<i32>} : memref<1x1x128xf32, #tpu.memory_space<vmem>>, vector<1x1x128xf32>,
    return
  }
  func.func @transform_0(%arg0: i32) -> (i32, i32) {
    %c0_i32 = arith.constant 0 : i32
    %c0_i32_0 = arith.constant 0 : i32
    return %arg0, %c0_i32 : i32, i32
  }
  func.func @transform_1(%arg0: i32) -> (i32, i32) {
    %c0_i32 = arith.constant 0 : i32
    %c0_i32_0 = arith.constant 0 : i32
    return %arg0, %c0_i32 : i32, i32
  }
  func.func @transform_2(%arg0: i32) -> (i32, i32, i32) {
    %c0_i32 = arith.constant 0 : i32
    %c0_i32_0 = arith.constant 0 : i32
    %c0_i32_1 = arith.constant 0 : i32
    return %arg0, %c0_i32, %c0_i32_0 : i32, i32, i32
  }
}

module attributes {stable_mosaic.version = 11 : i64} {
  func.func @_ss_partial_kernel(%arg0: i32, %arg1: memref<32x128xf32, #tpu.memory_space<vmem>>, %arg2: memref<1x1x128xf32, #tpu.memory_space<vmem>>) attributes {dimension_semantics = [#tpu.dimension_semantics<parallel>], iteration_bounds = array<i64: 1>, scalar_prefetch = 0 : i64, scratch_operands = 0 : i64, tpu.core_type = #tpu.core_type<tc>, window_params = [{transform_indices = @transform_0, window_bounds = array<i64: 32, 128>}, {transform_indices = @transform_1, window_bounds = array<i64: 1, 1, 128>}]} {
    %c0 = arith.constant 0 : index
    %c0_0 = arith.constant 0 : index
    %0 = vector.load %arg1[%c0, %c0_0] : memref<32x128xf32, #tpu.memory_space<vmem>>, vector<32x128xf32>
    %1 = arith.mulf %0, %0 : vector<32x128xf32>
    %cst = arith.constant dense<0.000000e+00> : vector<128xf32>
    %2 = vector.multi_reduction <add>, %1, %cst [0] : vector<32x128xf32> to vector<128xf32>
    %3 = vector.shape_cast %2 : vector<128xf32> to vector<1x128xf32>
    %c0_1 = arith.constant 0 : index
    %c0_2 = arith.constant 0 : index
    %c0_3 = arith.constant 0 : index
    %4 = vector.load %arg2[%c0_1, %c0_2, %c0_3] : memref<1x1x128xf32, #tpu.memory_space<vmem>>, vector<1x1x128xf32>
    %5 = vector.shape_cast %4 : vector<1x1x128xf32> to vector<1x128xf32>
    %6 = vector.shape_cast %3 : vector<1x128xf32> to vector<1x1x128xf32>
    tpu.vector_store %arg2[%c0_1, %c0_2, %c0_3], %6 {strides = array<i32>} : memref<1x1x128xf32, #tpu.memory_space<vmem>>, vector<1x1x128xf32>,
    return
  }
  func.func @transform_0(%arg0: i32) -> (i32, i32) {
    %c0_i32 = arith.constant 0 : i32
    %c0_i32_0 = arith.constant 0 : i32
    return %arg0, %c0_i32 : i32, i32
  }
  func.func @transform_1(%arg0: i32) -> (i32, i32, i32) {
    %c0_i32 = arith.constant 0 : i32
    %c0_i32_0 = arith.constant 0 : i32
    %c0_i32_1 = arith.constant 0 : i32
    return %arg0, %c0_i32, %c0_i32_0 : i32, i32, i32
  }
}

</mosaic_0001>

<bundles_post_ra>
// kernel: my_loss_pallas.2
= control target key start
LH: loop header
LB: loop body
LE: loop exit
PB: predicated region body
PF: predicated region fallthrough
CT: control target
= control target key end

     0   :  { %s215_s0 = inlined_call_operand.vmem [shape: f32[128,128], index: 0, kind: input, shape index: {}]   ;;  %s216_s1 = inlined_call_operand.vmem [shape: f32[128,128], index: 1, kind: input, shape index: {}]   ;;  %s217_s2 = inlined_call_operand.vmem [shape: f32[1,1,128], index: 2, kind: output, shape index: {}]  }
   0x1   :  { %v11_v0 = vld [vmem:[%s215_s0] sm:$0xff]  ;;  %v12_v1 = vld [vmem:[%s215_s0 + $0x8] sm:$0xff]  ;;  %v13_v2 = vld [vmem:[%s215_s0 + $0x10] sm:$0xff] }
   0x2   :  { %v27_v3 = vld [vmem:[%s216_s1] sm:$0xff]  ;;  %v28_v4 = vld [vmem:[%s216_s1 + $0x8] sm:$0xff]  ;;  %v29_v5 = vld [vmem:[%s216_s1 + $0x10] sm:$0xff] }
   0x3   :  { %v43_v6 = vsub.f32 %v11_v0, %v27_v3  ;;  %v44_v7 = vsub.f32 %v12_v1, %v28_v4  ;;  %v14_v8 = vld [vmem:[%s215_s0 + $0x18] sm:$0xff]  ;;  %v45_v10 = vsub.f32 %v13_v2, %v29_v5  ;;  %v15_v11 = vld [vmem:[%s215_s0 + $0x20] sm:$0xff]  ;;  %v16_v16 = vld [vmem:[%s215_s0 + $0x28] sm:$0xff] }
   0x4   :  { %v30_v9 = vld [vmem:[%s216_s1 + $0x18] sm:$0xff]  ;;  %v31_v12 = vld [vmem:[%s216_s1 + $0x20] sm:$0xff]  ;;  %v32_v17 = vld [vmem:[%s216_s1 + $0x28] sm:$0xff] }
   0x5   :  { %v46_v13 = vsub.f32 %v14_v8, %v30_v9  ;;  %v59_v14 = vmul.f32 %v43_v6, %v43_v6  ;;  %v60_v15 = vmul.f32 %v44_v7, %v44_v7  ;;  %v47_v18 = vsub.f32 %v15_v11, %v31_v12  ;;  %v17_v20 = vld [vmem:[%s215_s0 + $0x30] sm:$0xff]  ;;  %v18_v25 = vld [vmem:[%s215_s0 + $0x38] sm:$0xff]  ;;  %v19_v30 = vld [vmem:[%s215_s0 + $0x40] sm:$0xff] }
   0x6   :  { %v61_v19 = vmul.f32 %v45_v10, %v45_v10  ;;  %v33_v21 = vld [vmem:[%s216_s1 + $0x30] sm:$0xff]  ;;  %v48_v22 = vsub.f32 %v16_v16, %v32_v17  ;;  %v34_v26 = vld [vmem:[%s216_s1 + $0x38] sm:$0xff]  ;;  %v35_v31 = vld [vmem:[%s216_s1 + $0x40] sm:$0xff] }
   0x7   :  { %v62_v23 = vmul.f32 %v46_v13, %v46_v13  ;;  %v75_v24 = vadd.f32 %v60_v15, %v59_v14  ;;  %v49_v27 = vsub.f32 %v17_v20, %v33_v21  ;;  %v63_v28 = vmul.f32 %v47_v18, %v47_v18  ;;  %v20_v35 = vld [vmem:[%s215_s0 + $0x48] sm:$0xff]  ;;  %v21_v40 = vld [vmem:[%s215_s0 + $0x50] sm:$0xff]  ;;  %v22_v45 = vld [vmem:[%s215_s0 + $0x58] sm:$0xff] }
   0x8   :  { %v50_v32 = vsub.f32 %v18_v25, %v34_v26  ;;  %v64_v33 = vmul.f32 %v48_v22, %v48_v22  ;;  %v36_v36 = vld [vmem:[%s216_s1 + $0x48] sm:$0xff]  ;;  %v51_v37 = vsub.f32 %v19_v30, %v35_v31  ;;  %v37_v41 = vld [vmem:[%s216_s1 + $0x50] sm:$0xff]  ;;  %v38_v46 = vld [vmem:[%s216_s1 + $0x58] sm:$0xff] }
   0x9   :  { %v76_v29 = vadd.f32 %v75_v24, %v61_v19  ;;  %v65_v38 = vmul.f32 %v49_v27, %v49_v27  ;;  %v52_v42 = vsub.f32 %v20_v35, %v36_v36  ;;  %v53_v47 = vsub.f32 %v21_v40, %v37_v41  ;;  %v23_v50 = vld [vmem:[%s215_s0 + $0x60] sm:$0xff]  ;;  %v24_v55 = vld [vmem:[%s215_s0 + $0x68] sm:$0xff]  ;;  %v25_v60 = vld [vmem:[%s215_s0 + $0x70] sm:$0xff] }
   0xa   :  { %v66_v43 = vmul.f32 %v50_v32, %v50_v32  ;;  %v67_v48 = vmul.f32 %v51_v37, %v51_v37  ;;  %v39_v51 = vld [vmem:[%s216_s1 + $0x60] sm:$0xff]  ;;  %v54_v52 = vsub.f32 %v22_v45, %v38_v46  ;;  %v40_v56 = vld [vmem:[%s216_s1 + $0x68] sm:$0xff]  ;;  %v41_v61 = vld [vmem:[%s216_s1 + $0x70] sm:$0xff] }
   0xb   :  { %v77_v34 = vadd.f32 %v76_v29, %v62_v23  ;;  %v68_v53 = vmul.f32 %v52_v42, %v52_v42  ;;  %v55_v57 = vsub.f32 %v23_v50, %v39_v51  ;;  %v69_v58 = vmul.f32 %v53_v47, %v53_v47  ;;  %v26_v1 = vld [vmem:[%s215_s0 + $0x78] sm:$0xff] }
   0xc   :  { %v56_v62 = vsub.f32 %v24_v55, %v40_v56  ;;  %v70_v63 = vmul.f32 %v54_v52, %v54_v52  ;;  %v42_v2 = vld [vmem:[%s216_s1 + $0x78] sm:$0xff]  ;;  %v57_v3 = vsub.f32 %v25_v60, %v41_v61 }
   0xd   :  { %v78_v39 = vadd.f32 %v77_v34, %v63_v28  ;;  %v71_v4 = vmul.f32 %v55_v57, %v55_v57  ;;  %v58_v6 = vsub.f32 %v26_v1, %v42_v2 }
   0xe   :  { %v72_v7 = vmul.f32 %v56_v62, %v56_v62  ;;  %v73_v9 = vmul.f32 %v57_v3, %v57_v3 }
   0xf   :  { %v79_v44 = vadd.f32 %v78_v39, %v64_v33  ;;  %v74_v11 = vmul.f32 %v58_v6, %v58_v6 }
  0x11   :  { %v80_v49 = vadd.f32 %v79_v44, %v65_v38 }
  0x13   :  { %v81_v54 = vadd.f32 %v80_v49, %v66_v43 }
  0x15   :  { %v82_v59 = vadd.f32 %v81_v54, %v67_v48 }
  0x17   :  { %v83_v0 = vadd.f32 %v82_v59, %v68_v53 }
  0x19   :  { %v84_v5 = vadd.f32 %v83_v0, %v69_v58 }
  0x1b   :  { %v85_v8 = vadd.f32 %v84_v5, %v70_v63 }
  0x1d   :  { %v86_v10 = vadd.f32 %v85_v8, %v71_v4 }
  0x1f   :  { %v87_v12 = vadd.f32 %v86_v10, %v72_v7 }
  0x21   :  { %v88_v13 = vadd.f32 %v87_v12, %v73_v9 }
  0x23   :  { %v89_v14 = vadd.f32 %v88_v13, %v74_v11 }
  0x25   :  { %v90_v15 = vrot.slane %v89_v14, 4 }
  0x27   :  { %v91_v16 = vadd.f32 %v90_v15, %v89_v14 }
  0x29   :  { %v92_v17 = vrot.slane %v91_v16, 2 }
  0x2b   :  { %v93_v18 = vadd.f32 %v92_v17, %v91_v16 }
  0x2d   :  { %v94_v19 = vrot.slane %v93_v18, 1 }
  0x2f   :  { %v95_v20 = vadd.f32 %v94_v19, %v93_v18 }
  0x31   :  { %96 = vst [vmem:[%s217_s2] sm:$0x1] %v95_v20 }

// kernel: my_loss_pallas.3
= control target key start
LH: loop header
LB: loop body
LE: loop exit
PB: predicated region body
PF: predicated region fallthrough
CT: control target
= control target key end

     0   :  { %s55_s0 = inlined_call_operand.vmem [shape: f32[32,128], index: 0, kind: input, shape index: {}]   ;;  %s56_s1 = inlined_call_operand.vmem [shape: f32[1,1,128], index: 1, kind: output, shape index: {}]  }
   0x1   :  { %v8_v0 = vld [vmem:[%s55_s0] sm:$0xff]  ;;  %v9_v1 = vld [vmem:[%s55_s0 + $0x8] sm:$0xff]  ;;  %v10_v2 = vld [vmem:[%s55_s0 + $0x10] sm:$0xff] }
   0x2   :  { %v11_v3 = vld [vmem:[%s55_s0 + $0x18] sm:$0xff]  ;;  %v12_v4 = vmul.f32 %v8_v0, %v8_v0  ;;  %v13_v5 = vmul.f32 %v9_v1, %v9_v1  ;;  %v14_v6 = vmul.f32 %v10_v2, %v10_v2 }
   0x3   :  { %v15_v7 = vmul.f32 %v11_v3, %v11_v3 }
   0x4   :  { %v16_v8 = vadd.f32 %v13_v5, %v12_v4 }
   0x6   :  { %v17_v9 = vadd.f32 %v16_v8, %v14_v6 }
   0x8   :  { %v18_v10 = vadd.f32 %v17_v9, %v15_v7 }
   0xa   :  { %v19_v11 = vrot.slane %v18_v10, 4 }
   0xc   :  { %v20_v12 = vadd.f32 %v19_v11, %v18_v10 }
   0xe   :  { %v21_v13 = vrot.slane %v20_v12, 2 }
  0x10   :  { %v22_v14 = vadd.f32 %v21_v13, %v20_v12 }
  0x12   :  { %v23_v15 = vrot.slane %v22_v14, 1 }
  0x14   :  { %v24_v16 = vadd.f32 %v23_v15, %v22_v14 }
  0x16   :  { %25 = vst [vmem:[%s56_s1] sm:$0x1] %v24_v16 }

</bundles_post_ra>
